<compile_context>
chip_gen: v7x
topology: tpu7x:2x2x1
jax: 0.10.0
libtpu: 0.0.40
codegen_flags: <defaults>
</compile_context>

<pallas_src>
import math

import jax
import jax.numpy as jnp
from jax.experimental import pallas as pl
from jax.experimental.pallas import tpu as pltpu


# ----------------------------- Pallas kernel ------------------------------ #
def deepfm_kernel(dense_ref, emb_ref,
                  w1d_ref, w1e_ref, b1_ref,
                  w2_ref, b2_ref, wo_ref,
                  out_ref):
    H1 = w2_ref.shape[0]                  # first hidden width
    W = w1e_ref.shape[1]                  # H1 + 1 + E  (fused layer-1 width)

    dense = dense_ref[...]                # (tb, Dd)    matmul_dtype
    emb = emb_ref[...]                    # (tb, F*E)   matmul_dtype, lane-dense

    # One fused matmul -> [ DNN hidden-1 | FM linear (+biases) | per-field sums ]
    h_all = (jnp.dot(dense, w1d_ref[...], preferred_element_type=jnp.float32)
             + jnp.dot(emb, w1e_ref[...], preferred_element_type=jnp.float32)
             + b1_ref[...])                                   # (tb, H1+1+E) f32
    linear = h_all[:, H1:H1 + 1]          # FM linear + fm_b + deep output bias
    s = h_all[:, H1 + 1:W]                # (tb, E): sum over fields of embeddings
    h = jnp.maximum(h_all[:, :H1], 0.0)   # (tb, H1) ReLU

    # FM 2nd-order: 0.5 * [ (sum_f v)^2 - sum_f v^2 ] reduced over E (lane reduces).
    emb_f = emb.astype(jnp.float32)
    inter = 0.5 * (jnp.sum(s * s, axis=-1, keepdims=True)
                   - jnp.sum(emb_f * emb_f, axis=-1, keepdims=True))   # (tb, 1)

    # Second DNN layer.
    h = jnp.dot(h.astype(w2_ref.dtype), w2_ref[...],
                preferred_element_type=jnp.float32) + b2_ref[...]
    h = jnp.maximum(h, 0.0)
    # TODO(synk): nn.Dropout is identity in eval mode; training-mode dropout not implemented.

    # Output layer as VPU multiply + lane reduce (no (H2, 1) MXU matmul).
    deep = jnp.sum(h * wo_ref[...], axis=-1, keepdims=True)             # (tb, 1)

    out_ref[...] = jax.nn.sigmoid(linear + inter + deep)


# ------------------------------ Wrapper ----------------------------------- #
def _round_up(x, m):
    return ((x + m - 1) // m) * m


def _cdiv(a, b):
    return (a + b - 1) // b


def deepfm_forward(dense, sparse, params, *, matmul_dtype=jnp.bfloat16,
                   max_tile=2048):
    """DeepFM inference forward. Returns (B,) probabilities.

    matmul_dtype controls the dtype of the MXU operands AND of the HBM embedding
    slab. bf16 (default) halves the dominant mem-bound stream on all TPU gens;
    accumulation and all elementwise/sigmoid math stay f32. Pass jnp.float32 to
    match the PyTorch reference essentially exactly.
    """
    tables = params["embed_tables"]
    B, Dd = dense.shape
    F = len(tables)
    E = tables[0].shape[1]
    assert all(t.shape[1] == E for t in tables), \
        "kernel assumes every embedding table has the same embed_dim"

    H1 = params["w1"].shape[1]
    H2 = params["w2"].shape[1]
    O = params["wo"].shape[1]
    assert O == 1, "kernel assumes output_dim == 1 (module squeezes to (B,))"
    # Keep [hidden-1 | FM linear | field-sum] columns inside one 128-lane group
    # so the in-kernel column slices never cross a lane-tile boundary.
    assert H1 + 1 + E <= 128, "H1 + 1 + embed_dim must fit one 128-lane group"

    # ---- single stacked-table gather (one fused XLA gather, slab in bf16) ----
    sizes = [int(t.shape[0]) for t in tables]
    offsets = jnp.asarray([sum(sizes[:i]) for i in range(F)], dtype=jnp.int32)
    table_stack = jnp.concatenate(tables, axis=0).astype(matmul_dtype)  # (sum_n, E)
    flat_idx = sparse.astype(jnp.int32) + offsets[None, :]              # (B, F)
    emb2d = jnp.take(table_stack, flat_idx, axis=0).reshape(B, F * E)   # (B, F*E)
    dense = dense.astype(matmul_dtype)

    # ---- fold FM linear column, biases and block-sum matrix into layer-1 ----
    w1_aug = jnp.concatenate([params["w1"], params["fm_w"]], axis=1)     # (C, H1+1)
    b1_aug = jnp.concatenate([params["b1"], params["fm_b"] + params["bo"]],
                             axis=1)                                     # (1, H1+1)
    w1d = w1_aug[:Dd]                                                    # (Dd, H1+1)
    w1e = w1_aug[Dd:]                                                    # (F*E, H1+1)
    # S[k, e] = 1 iff k % E == e  ->  emb @ S = per-field embedding sums.
    S = (jnp.arange(F * E)[:, None] % E ==
         jnp.arange(E)[None, :]).astype(jnp.float32)                    # (F*E, E)
    w1d_pad = jnp.concatenate([w1d, jnp.zeros((Dd, E), jnp.float32)], axis=1)
    w1e_aug = jnp.concatenate([w1e, S], axis=1)                          # (F*E, H1+1+E)
    b1_pad = jnp.concatenate([b1_aug, jnp.zeros((1, E), jnp.float32)], axis=1)

    w1d_pad = w1d_pad.astype(matmul_dtype)
    w1e_aug = w1e_aug.astype(matmul_dtype)
    w2 = params["w2"].astype(matmul_dtype)                               # (H1, H2)
    b2 = params["b2"]                                                    # (1, H2) f32
    wo_row = params["wo"].reshape(1, H2)                                 # (1, H2) f32

    # ---- batch tiling from a VMEM budget ----
    itm = jnp.dtype(matmul_dtype).itemsize
    sub = 16 if itm == 2 else 8                 # sublane packing multiple
    row_bytes = (Dd + F * E) * itm + 4          # pipelined inputs + f32 output col
    act_budget = 8 * 1024 * 1024                # double-buffered activation tiles
    tb_cap = max(sub, (act_budget // (2 * row_bytes)) // sub * sub)
    tb_target = max(sub, min(max_tile, tb_cap))

    B_sub = _round_up(B, sub)
    # >= 2 grid steps whenever the batch allows it so ("parallel",) batch tiles
    # shard across both TensorCores on v7x (v5e/v6e: just pipelining).
    n_tiles = max(2, _cdiv(B_sub, tb_target)) if B_sub >= 2 * sub else 1
    align = 128 if (B_sub // n_tiles) >= 128 else sub   # full-M MXU passes on v5e
    tb = _round_up(_cdiv(B_sub, n_tiles), align)
    B_pad = n_tiles * tb

    if B_pad != B:
        dense = jnp.pad(dense, ((0, B_pad - B), (0, 0)))
        emb2d = jnp.pad(emb2d, ((0, B_pad - B), (0, 0)))
    grid = (n_tiles,)

    # Explicit scoped-VMEM limit: 2x (double-buffer) the tile + resident weights,
    # generous headroom, capped at 32 MiB (safe under v7x's 64 MiB physical and
    # above v5e's 16 MiB default).
    tile_bytes = tb * row_bytes
    weight_bytes = sum(int(a.size) * a.dtype.itemsize
                       for a in (w1d_pad, w1e_aug, b1_pad, w2, b2, wo_row))
    vmem_need = 2 * (tile_bytes + weight_bytes)
    vmem_limit = int(min(max(4 * vmem_need, 16 << 20), 32 << 20))

    def full(arr):
        return pl.BlockSpec(arr.shape, lambda i: (0, 0))

    out = pl.pallas_call(
        deepfm_kernel,
        out_shape=jax.ShapeDtypeStruct((B_pad, 1), jnp.float32),
        grid=grid,
        in_specs=[
            pl.BlockSpec((tb, Dd), lambda i: (i, 0)),        # dense tile
            pl.BlockSpec((tb, F * E), lambda i: (i, 0)),     # embedding slab tile
            full(w1d_pad), full(w1e_aug), full(b1_pad),      # fused layer-1 (+FM linear +S)
            full(w2), full(b2),                              # layer-2
            full(wo_row),                                    # output row (VPU reduce)
        ],
        out_specs=pl.BlockSpec((tb, 1), lambda i: (i, 0)),
        compiler_params=pltpu.CompilerParams(
            dimension_semantics=("parallel",),
            vmem_limit_bytes=vmem_limit),
    )(dense, emb2d, w1d_pad, w1e_aug, b1_pad, w2, b2, wo_row)

    # torch: sigmoid(...).squeeze() -> (B,) when output_dim == 1
    return out[:B, 0]


# --------------------------- Reference (pure JAX) -------------------------- #
def deepfm_reference(dense, sparse, params):
    tables = params["embed_tables"]
    B = dense.shape[0]
    F = len(tables)
    emb = jnp.stack([jnp.take(tables[i], sparse[:, i], axis=0) for i in range(F)],
                    axis=1)                                   # (B, F, E)
    stack = jnp.concatenate([dense, emb.reshape(B, -1)], axis=-1)
    linear = stack @ params["fm_w"] + params["fm_b"]
    inter = jnp.sum(emb, axis=1) ** 2 - jnp.sum(emb ** 2, axis=1)
    fm_out = linear + 0.5 * jnp.sum(inter, axis=-1, keepdims=True)
    h = jax.nn.relu(stack @ params["w1"] + params["b1"])
    h = jax.nn.relu(h @ params["w2"] + params["b2"])
    deep = h @ params["wo"] + params["bo"]
    return jax.nn.sigmoid(fm_out + deep)[:, 0]


# --------------------------- Parameter init -------------------------------- #
def xavier_normal(key, in_dim, out_dim):
    std = math.sqrt(2.0 / (in_dim + out_dim))
    return std * jax.random.normal(key, (in_dim, out_dim), jnp.float32)


def init_deepfm_params(key, embed_num, embed_dim, concat_dim, hidden_units,
                       output_dim):
    keys = jax.random.split(key, len(embed_num) + 8)
    k_iter = iter(keys)
    # EmbedLayer: uniform(-0.05, 0.05)
    embed_tables = [
        jax.random.uniform(next(k_iter), (n, embed_dim), jnp.float32, -0.05, 0.05)
        for n in embed_num
    ]
    params = {
        "embed_tables": embed_tables,
        # FMLayer fc: xavier_normal weight, zero bias (stored as (in, out))
        "fm_w": xavier_normal(next(k_iter), concat_dim, 1),
        "fm_b": jnp.zeros((1, 1), jnp.float32),
        # DNN hidden layers (hidden_units = [concat_dim, h1, h2])
        "w1": xavier_normal(next(k_iter), hidden_units[0], hidden_units[1]),
        "b1": jnp.zeros((1, hidden_units[1]), jnp.float32),
        "w2": xavier_normal(next(k_iter), hidden_units[1], hidden_units[2]),
        "b2": jnp.zeros((1, hidden_units[2]), jnp.float32),
        # DNN output layer
        "wo": xavier_normal(next(k_iter), hidden_units[2], output_dim),
        "bo": jnp.zeros((1, output_dim), jnp.float32),
    }
    return params


# ------------------------------- Main -------------------------------------- #
if __name__ == "__main__":
    key = jax.random.PRNGKey(0)

    # Small, module-consistent shapes
    batch = 8
    embed_num = [10, 20, 30, 40]       # 4 sparse features
    embed_dim = 8
    dense_dim = 8
    concat_dim = dense_dim + len(embed_num) * embed_dim   # 40
    hidden_units = [concat_dim, 32, 16]
    output_dim = 1
    dropout = 0.5                      # identity at inference

    k_params, k_dense, k_sparse = jax.random.split(key, 3)
    params = init_deepfm_params(k_params, embed_num, embed_dim,
                                concat_dim, hidden_units, output_dim)

    dense = jax.random.normal(k_dense, (batch, dense_dim), jnp.float32)
    sks = jax.random.split(k_sparse, len(embed_num))
    sparse = jnp.stack(
        [jax.random.randint(sks[i], (batch,), 0, n, jnp.int32)
         for i, n in enumerate(embed_num)],
        axis=1,
    )                                                     # (B, num_sparse)

    ref = deepfm_reference(dense, sparse, params)

    # Default path: bf16 MXU operands + bf16 HBM embedding slab, f32 accumulate.
    out_bf16 = deepfm_forward(dense, sparse, params)
    jax.block_until_ready(out_bf16)
    assert out_bf16.shape == (batch,)
    assert bool(jnp.all(jnp.isfinite(out_bf16)))
    assert bool(jnp.allclose(out_bf16, ref, atol=5e-2)), (out_bf16, ref)

    # f32 path: matches the PyTorch module numerics.
    out_f32 = deepfm_forward(dense, sparse, params, matmul_dtype=jnp.float32)
    jax.block_until_ready(out_f32)
    assert bool(jnp.allclose(out_f32, ref, atol=1e-4)), (out_f32, ref)

    print("KERNEL_OK")
</pallas_src>

<mosaic_0001>
module attributes {stable_mosaic.version = 11 : i64} {
  func.func @deepfm_kernel(%arg0: i32, %arg1: memref<16x8xbf16, #tpu.memory_space<vmem>>, %arg2: memref<16x32xbf16, #tpu.memory_space<vmem>>, %arg3: memref<8x41xbf16, #tpu.memory_space<vmem>>, %arg4: memref<32x41xbf16, #tpu.memory_space<vmem>>, %arg5: memref<1x41xf32, #tpu.memory_space<vmem>>, %arg6: memref<32x16xbf16, #tpu.memory_space<vmem>>, %arg7: memref<1x16xf32, #tpu.memory_space<vmem>>, %arg8: memref<1x16xf32, #tpu.memory_space<vmem>>, %arg9: memref<16x1xf32, #tpu.memory_space<vmem>>) attributes {dimension_semantics = [#tpu.dimension_semantics<parallel>], iteration_bounds = array<i64: 1>, scalar_prefetch = 0 : i64, scratch_operands = 0 : i64, tpu.core_type = #tpu.core_type<tc>, window_params = [{transform_indices = @transform_0, window_bounds = array<i64: 16, 8>}, {transform_indices = @transform_1, window_bounds = array<i64: 16, 32>}, {pipeline_mode = #tpu.pipeline_mode<synchronous>, transform_indices = @transform_2, window_bounds = array<i64: 8, 41>}, {pipeline_mode = #tpu.pipeline_mode<synchronous>, transform_indices = @transform_3, window_bounds = array<i64: 32, 41>}, {pipeline_mode = #tpu.pipeline_mode<synchronous>, transform_indices = @transform_4, window_bounds = array<i64: 1, 41>}, {pipeline_mode = #tpu.pipeline_mode<synchronous>, transform_indices = @transform_5, window_bounds = array<i64: 32, 16>}, {pipeline_mode = #tpu.pipeline_mode<synchronous>, transform_indices = @transform_6, window_bounds = array<i64: 1, 16>}, {pipeline_mode = #tpu.pipeline_mode<synchronous>, transform_indices = @transform_7, window_bounds = array<i64: 1, 16>}, {transform_indices = @transform_8, window_bounds = array<i64: 16, 1>}]} {
    %c0 = arith.constant 0 : index
    %c0_0 = arith.constant 0 : index
    %0 = vector.load %arg1[%c0, %c0_0] : memref<16x8xbf16, #tpu.memory_space<vmem>>, vector<16x8xbf16>
    %c0_1 = arith.constant 0 : index
    %c0_2 = arith.constant 0 : index
    %1 = vector.load %arg2[%c0_1, %c0_2] : memref<16x32xbf16, #tpu.memory_space<vmem>>, vector<16x32xbf16>
    %c0_3 = arith.constant 0 : index
    %c0_4 = arith.constant 0 : index
    %2 = vector.load %arg3[%c0_3, %c0_4] : memref<8x41xbf16, #tpu.memory_space<vmem>>, vector<8x41xbf16>
    %cst = arith.constant dense<0.000000e+00> : vector<16x41xf32>
    %3 = tpu.matmul %0, %2, %cst {dimension_numbers = #tpu.dot_dimension_numbers<[1], [0], [0], [1], [0, 0, 1, 1], [], []>} : vector<16x8xbf16>, vector<8x41xbf16>, vector<16x41xf32> -> vector<16x41xf32>
    %c0_5 = arith.constant 0 : index
    %c0_6 = arith.constant 0 : index
    %4 = vector.load %arg4[%c0_5, %c0_6] : memref<32x41xbf16, #tpu.memory_space<vmem>>, vector<32x41xbf16>
    %cst_7 = arith.constant dense<0.000000e+00> : vector<16x41xf32>
    %5 = tpu.matmul %1, %4, %cst_7 {dimension_numbers = #tpu.dot_dimension_numbers<[1], [0], [0], [1], [0, 0, 1, 1], [], []>} : vector<16x32xbf16>, vector<32x41xbf16>, vector<16x41xf32> -> vector<16x41xf32>
    %6 = arith.addf %3, %5 : vector<16x41xf32>
    %c0_8 = arith.constant 0 : index
    %c0_9 = arith.constant 0 : index
    %7 = vector.load %arg5[%c0_8, %c0_9] : memref<1x41xf32, #tpu.memory_space<vmem>>, vector<1x41xf32>
    %8 = vector.broadcast %7 : vector<1x41xf32> to vector<16x41xf32>
    %9 = arith.addf %6, %8 : vector<16x41xf32>
    %10 = vector.extract_strided_slice %9 {offsets = [0, 32], sizes = [16, 1], strides = [1, 1]} : vector<16x41xf32> to vector<16x1xf32>
    %11 = vector.extract_strided_slice %9 {offsets = [0, 33], sizes = [16, 8], strides = [1, 1]} : vector<16x41xf32> to vector<16x8xf32>
    %12 = vector.extract_strided_slice %9 {offsets = [0, 0], sizes = [16, 32], strides = [1, 1]} : vector<16x41xf32> to vector<16x32xf32>
    %cst_10 = arith.constant 0.000000e+00 : f32
    %13 = vector.broadcast %cst_10 : f32 to vector<16x32xf32>
    %14 = arith.maximumf %12, %13 : vector<16x32xf32>
    %15 = arith.extf %1 : vector<16x32xbf16> to vector<16x32xf32>
    %16 = arith.mulf %11, %11 : vector<16x8xf32>
    %cst_11 = arith.constant dense<0.000000e+00> : vector<16xf32>
    %17 = vector.multi_reduction <add>, %16, %cst_11 [1] : vector<16x8xf32> to vector<16xf32>
    %18 = vector.shape_cast %17 : vector<16xf32> to vector<16x1xf32>
    %19 = arith.mulf %15, %15 : vector<16x32xf32>
    %cst_12 = arith.constant dense<0.000000e+00> : vector<16xf32>
    %20 = vector.multi_reduction <add>, %19, %cst_12 [1] : vector<16x32xf32> to vector<16xf32>
    %21 = vector.shape_cast %20 : vector<16xf32> to vector<16x1xf32>
    %22 = arith.subf %18, %21 : vector<16x1xf32>
    %cst_13 = arith.constant 5.000000e-01 : f32
    %23 = vector.broadcast %cst_13 : f32 to vector<16x1xf32>
    %24 = arith.mulf %23, %22 : vector<16x1xf32>
    %25 = arith.truncf %14 : vector<16x32xf32> to vector<16x32xbf16>
    %c0_14 = arith.constant 0 : index
    %c0_15 = arith.constant 0 : index
    %26 = vector.load %arg6[%c0_14, %c0_15] : memref<32x16xbf16, #tpu.memory_space<vmem>>, vector<32x16xbf16>
    %cst_16 = arith.constant dense<0.000000e+00> : vector<16x16xf32>
    %27 = tpu.matmul %25, %26, %cst_16 {dimension_numbers = #tpu.dot_dimension_numbers<[1], [0], [0], [1], [0, 0, 1, 1], [], []>} : vector<16x32xbf16>, vector<32x16xbf16>, vector<16x16xf32> -> vector<16x16xf32>
    %c0_17 = arith.constant 0 : index
    %c0_18 = arith.constant 0 : index
    %28 = vector.load %arg7[%c0_17, %c0_18] : memref<1x16xf32, #tpu.memory_space<vmem>>, vector<1x16xf32>
    %29 = vector.broadcast %28 : vector<1x16xf32> to vector<16x16xf32>
    %30 = arith.addf %27, %29 : vector<16x16xf32>
    %cst_19 = arith.constant 0.000000e+00 : f32
    %31 = vector.broadcast %cst_19 : f32 to vector<16x16xf32>
    %32 = arith.maximumf %30, %31 : vector<16x16xf32>
    %c0_20 = arith.constant 0 : index
    %c0_21 = arith.constant 0 : index
    %33 = vector.load %arg8[%c0_20, %c0_21] : memref<1x16xf32, #tpu.memory_space<vmem>>, vector<1x16xf32>
    %34 = vector.broadcast %33 : vector<1x16xf32> to vector<16x16xf32>
    %35 = arith.mulf %32, %34 : vector<16x16xf32>
    %cst_22 = arith.constant dense<0.000000e+00> : vector<16xf32>
    %36 = vector.multi_reduction <add>, %35, %cst_22 [1] : vector<16x16xf32> to vector<16xf32>
    %37 = vector.shape_cast %36 : vector<16xf32> to vector<16x1xf32>
    %38 = arith.addf %10, %24 : vector<16x1xf32>
    %39 = arith.addf %38, %37 : vector<16x1xf32>
    %40 = arith.negf %39 : vector<16x1xf32>
    %41 = math.exp %40 : vector<16x1xf32>
    %cst_23 = arith.constant 1.000000e+00 : f32
    %42 = vector.broadcast %cst_23 : f32 to vector<16x1xf32>
    %43 = arith.addf %42, %41 : vector<16x1xf32>
    %44 = arith.divf %42, %43 : vector<16x1xf32>
    %c0_24 = arith.constant 0 : index
    %c0_25 = arith.constant 0 : index
    %45 = vector.load %arg9[%c0_24, %c0_25] : memref<16x1xf32, #tpu.memory_space<vmem>>, vector<16x1xf32>
    tpu.vector_store %arg9[%c0_24, %c0_25], %44 {strides = array<i32>} : memref<16x1xf32, #tpu.memory_space<vmem>>, vector<16x1xf32>,
    return
  }
  func.func @transform_0(%arg0: i32) -> (i32, i32) {
    %c0_i32 = arith.constant 0 : i32
    %c0_i32_0 = arith.constant 0 : i32
    return %arg0, %c0_i32 : i32, i32
  }
  func.func @transform_1(%arg0: i32) -> (i32, i32) {
    %c0_i32 = arith.constant 0 : i32
    %c0_i32_0 = arith.constant 0 : i32
    return %arg0, %c0_i32 : i32, i32
  }
  func.func @transform_2(%arg0: i32) -> (i32, i32) {
    %c0_i32 = arith.constant 0 : i32
    %c0_i32_0 = arith.constant 0 : i32
    %c0_i32_1 = arith.constant 0 : i32
    return %c0_i32, %c0_i32_0 : i32, i32
  }
  func.func @transform_3(%arg0: i32) -> (i32, i32) {
    %c0_i32 = arith.constant 0 : i32
    %c0_i32_0 = arith.constant 0 : i32
    %c0_i32_1 = arith.constant 0 : i32
    return %c0_i32, %c0_i32_0 : i32, i32
  }
  func.func @transform_4(%arg0: i32) -> (i32, i32) {
    %c0_i32 = arith.constant 0 : i32
    %c0_i32_0 = arith.constant 0 : i32
    %c0_i32_1 = arith.constant 0 : i32
    return %c0_i32, %c0_i32_0 : i32, i32
  }
  func.func @transform_5(%arg0: i32) -> (i32, i32) {
    %c0_i32 = arith.constant 0 : i32
    %c0_i32_0 = arith.constant 0 : i32
    %c0_i32_1 = arith.constant 0 : i32
    return %c0_i32, %c0_i32_0 : i32, i32
  }
  func.func @transform_6(%arg0: i32) -> (i32, i32) {
    %c0_i32 = arith.constant 0 : i32
    %c0_i32_0 = arith.constant 0 : i32
    %c0_i32_1 = arith.constant 0 : i32
    return %c0_i32, %c0_i32_0 : i32, i32
  }
  func.func @transform_7(%arg0: i32) -> (i32, i32) {
    %c0_i32 = arith.constant 0 : i32
    %c0_i32_0 = arith.constant 0 : i32
    %c0_i32_1 = arith.constant 0 : i32
    return %c0_i32, %c0_i32_0 : i32, i32
  }
  func.func @transform_8(%arg0: i32) -> (i32, i32) {
    %c0_i32 = arith.constant 0 : i32
    %c0_i32_0 = arith.constant 0 : i32
    return %arg0, %c0_i32 : i32, i32
  }
}

</mosaic_0001>

<bundles_post_ra>
// kernel: tpu_custom_call.1
= control target key start
LH: loop header
LB: loop body
LE: loop exit
PB: predicated region body
PF: predicated region fallthrough
CT: control target
= control target key end

     0   :  { %vm110_vm0 = vcmask 1043456   ;;  %v376_v0 = vmov 0.0   ;;  %vm377_vm1 = vmmov 0   ;;  %vm106_vm2 = vcmask 64512   ;;  %s468_s3 = inlined_call_operand.vmem [shape: bf16[32,41], index: 3, kind: input, shape index: {}]   ;;  %s469_s2 = inlined_call_operand.vmem [shape: bf16[8,41], index: 2, kind: input, shape index: {}]   ;;  %s470_s0 = inlined_call_operand.vmem [shape: bf16[16,8], index: 0, kind: input, shape index: {}]   ;;  %s471_s1 = inlined_call_operand.vmem [shape: bf16[16,32], index: 1, kind: input, shape index: {}]   ;;  %s472_s5 = inlined_call_operand.vmem [shape: bf16[32,16], index: 5, kind: input, shape index: {}]   ;;  %s473_s4 = inlined_call_operand.vmem [shape: f32[1,41], index: 4, kind: input, shape index: {}]   ;;  %s474_s6 = inlined_call_operand.vmem [shape: f32[1,16], index: 6, kind: input, shape index: {}]   ;;  %s475_s7 = inlined_call_operand.vmem [shape: f32[1,16], index: 7, kind: input, shape index: {}]   ;;  %s476_s8 = inlined_call_operand.vmem [shape: f32[16,1], index: 8, kind: output, shape index: {}]  }
   0x1   :  { %335 = vmatprep.subr.bf16.mxu0 %v376_v0  ;;  %v361_v1 = vld [vmem:[%s468_s3] sm:$0xff]   ;;  %343 = vmatprep.subr.bf16.mxu1 %v376_v0  ;;  %v362_v4 = vld [vmem:[%s468_s3 + $0x8] sm:$0xff]   ;;  %vm56_vm3 = vcmask 261120   ;;  %vm275_vm4 = vcmask 130048   ;;  %vm306_vm5 = vcmask 7168  }
   0x2   :  { %v34_v2 = vld [vmem:[%s469_s2] sm:$0xf]  ;;  %345 = vmatprep.mubr.msk.bf16.mxu1 %vm377_vm1, %v376_v0  ;;  %339 = vmatprep.mubr.msk.bf16.mxu0 %vm377_vm1, %v376_v0  ;;  %v366_v8 = vld [vmem:[%s472_s5 + $0x8] sm:$0xff]  }
   0x3   :  { %336 = vmatpush3.bf16.msra.mxu0 %v361_v1  ;;  %v112_v3 = vsel %vm110_vm0, %v34_v2, 0  ;;  %v363_v5 = vld [vmem:[%s470_s0] sm:$0xff]  }
   0x4   :  { %344 = vmatpush3.bf16.msra.mxu1 %v112_v3  ;;  %337 = vmatprep.subr.bf16.mxu0 %v376_v0  ;;  %v32_v6 = vld [vmem:[%s471_s1] sm:$0xff]  }
   0x5   :  { %349 = vmatprep.subr.bf16.mxu1 %v376_v0  ;;  %v365_v7 = vld [vmem:[%s472_s5] sm:$0xff]   ;;  %v167_v9 = vunpack.c.h.bf16 %v32_v6  ;;  %s378_s5 = smov 95   ;;  %v166_v30 = vunpack.c.l.bf16 %v32_v6 }
   0x6   :  { %v319_v16 = vld [vmem:[%s473_s4] ss:$0 sm:$0xff] }
   0x7   :  { %338 = vmatpush3.bf16.msra.mxu0 %v362_v4  ;;  %346 = vmatmul.mubr.msk.bf16.vlgmr.msra.gmra.mrb[0].mxu1 %vm106_vm2, %v363_v5  ;;  %v185_v10 = vmul.f32 %v167_v9, %v167_v9  ;;  %v184_v31 = vmul.f32 %v166_v30, %v166_v30  ;;  %v320_v37 = vld [vmem:[%s474_s6] ss:$0 sm:$0xff]  ;;  %s379_s6 = smov 96  }
   0x8   :  { %353 = vmatprep.mubr.msk.bf16.mxu1 %vm377_vm1, %v376_v0  ;;  %350 = vmatpush3.bf16.msra.mxu1 %v365_v7  ;;  %v324_v42 = vld [vmem:[%s475_s7] ss:$0 sm:$0xff] }
   0x9   :  { %351 = vmatprep.subr.bf16.mxu1 %v376_v0  ;;  %v189_v11 = vsel %vm56_vm3, %v185_v10, 0.0  ;;  %v186_v32 = vsel %vm56_vm3, %v184_v31, 0.0 }
   0xa   :  { %340 = vmatmul.mubr.msk.bf16.vlgmr.msra.gmra.mrb[0].mxu0 %vm56_vm3, %v32_v6  ;;  %190 = vadd.xlane.f32.xlu1 %v189_v11 }
   0xc   :  { %352 = vmatpush3.bf16.msra.mxu1 %v366_v8 }
  0x97   :  { %v191_v51 = vpop.xlane.xlu1 %190 }
  0xda   :  { %v148_v12 = vpop.f32.mrb[0].mxu1 }
  0xdb   :  { %v347_v13 = vpop.f32.mrb[1].mxu1 }
  0xdc   :  { %v151_v14 = vpop.f32.mrb[2].mxu1 }
  0xdd   :  { %v94_v15 = vpop.f32.mrb[0].mxu0  ;;  %v348_v17 = vpop.f32.mrb[3].mxu1 }
  0xde   :  { %v149_v18 = vadd.f32 %v148_v12, %v94_v15  ;;  %v341_v19 = vpop.f32.mrb[1].mxu0 }
  0xdf   :  { %v97_v20 = vpop.f32.mrb[2].mxu0 }
  0xe0   :  { %v162_v21 = vadd.f32 %v319_v16, %v149_v18  ;;  %v152_v22 = vadd.f32 %v151_v14, %v97_v20  ;;  %v342_v23 = vpop.f32.mrb[3].mxu0 }
  0xe2   :  { %v163_v24 = vadd.f32 %v319_v16, %v152_v22  ;;  %v168_v25 = vmul.f32 %v162_v21, %v162_v21  ;;  %v164_v26 = vmax.f32 %v162_v21, 0.0 }
  0xe4   :  { %v165_v27 = vmax.f32 %v163_v24, 0.0  ;;  %172 = vrot.lane.b32.xlu0 %v168_v25, %s378_s5  ;;  %v169_v29 = vmul.f32 %v163_v24, %v163_v24 }
  0xe6   :  { %v196_v28 = vpack.c.bf16 %v165_v27, %v164_v26 }
  0xe8   :  { %174 = vrot.lane.b32.xlu0 %v169_v29, %s378_s5  ;;  %354 = vmatmul.mubr.msk.bf16.vlgmr.msra.gmra.mrb[4].mxu1 %vm56_vm3, %v196_v28 }
 0x107   :  { %187 = vadd.xlane.f32.xlu0 %v186_v32 }
 0x156   :  { %v173_v33 = vpop.permute.xlu0 %172 }
 0x157   :  { %v178_v34 = vsel %vm106_vm2, %v173_v33, 0.0 }
 0x158   :  { %179 = vadd.xlane.f32.xlu1 %v178_v34 }
 0x15a   :  { %v175_v35 = vpop.permute.xlu0 %174 }
 0x15b   :  { %v181_v36 = vsel %vm106_vm2, %v175_v35, 0.0 }
 0x15c   :  { %182 = vadd.xlane.f32.xlu1 %v181_v36 }
 0x194   :  { %v188_v53 = vpop.xlane.xlu0 %187 }
 0x1bb   :  { %v257_v38 = vpop.f32.mrb[4].mxu1 }
 0x1bc   :  { %v258_v39 = vadd.f32 %v320_v37, %v257_v38  ;;  %v355_v40 = vpop.f32.mrb[5].mxu1 }
 0x1bd   :  { %v260_v41 = vpop.f32.mrb[6].mxu1 }
 0x1be   :  { %v264_v43 = vmax.f32 %v258_v39, 0.0  ;;  %v261_v44 = vadd.f32 %v320_v37, %v260_v41  ;;  %v356_v45 = vpop.f32.mrb[7].mxu1 }
 0x1c0   :  { %v265_v46 = vmax.f32 %v261_v44, 0.0  ;;  %v273_v47 = vmul.f32 %v324_v42, %v264_v43 }
 0x1c2   :  { %v276_v48 = vsel %vm275_vm4, %v273_v47, 0.0  ;;  %v274_v49 = vmul.f32 %v324_v42, %v265_v46 }
 0x1c3   :  { %277 = vadd.xlane.f32.xlu1 %v276_v48 }
 0x1c4   :  { %v279_v50 = vsel %vm275_vm4, %v274_v49, 0.0 }
 0x1c7   :  { %280 = vadd.xlane.f32.xlu1 %v279_v50 }
 0x1e5   :  { %v180_v52 = vpop.xlane.xlu1 %179 }
 0x1e6   :  { %v192_v54 = vsub.f32 %v180_v52, %v188_v53 }
 0x1e8   :  { %v194_v56 = vmul.f32 0.5, %v192_v54 }
 0x1e9   :  { %v183_v55 = vpop.xlane.xlu1 %182 }
 0x1ea   :  { %v193_v57 = vsub.f32 %v183_v55, %v191_v51  ;;  %v282_v59 = vadd.f32 %v194_v56, %v162_v21 }
 0x1ec   :  { %v195_v58 = vmul.f32 0.5, %v193_v57 }
 0x1ee   :  { %v283_v63 = vadd.f32 %v195_v58, %v163_v24 }
 0x250   :  { %v278_v60 = vpop.xlane.xlu1 %277 }
 0x251   :  { %v284_v61 = vadd.f32 %v282_v59, %v278_v60 }
 0x253   :  { %v325_v62 = vmul.f32 -1.442695, %v284_v61 }
 0x254   :  { %v281_v0 = vpop.xlane.xlu1 %280 }
 0x255   :  { %368 = vpow2.f32 %v325_v62  ;;  %v285_v1 = vadd.f32 %v283_v63, %v281_v0 }
 0x257   :  { %v326_v2 = vmul.f32 -1.442695, %v285_v1 }
 0x259   :  { %370 = vpow2.f32 %v326_v2 }
 0x25f   :  { %v369_v3 = vpop.eup %368 }
 0x260   :  { %v292_v4 = vadd.f32 1.0, %v369_v3 }
 0x262   :  { %372 = vrcp.f32 %v292_v4 }
 0x263   :  { %v371_v5 = vpop.eup %370 }
 0x264   :  { %v293_v6 = vadd.f32 1.0, %v371_v5 }
 0x266   :  { %374 = vrcp.f32 %v293_v6 }
 0x26c   :  { %v373_v7 = vpop.eup %372 }
 0x26d   :  { %300 = vrot.lane.b32.xlu1 %v373_v7, %s379_s6 }
 0x270   :  { %v375_v8 = vpop.eup %374 }
 0x271   :  { %302 = vrot.lane.b32.xlu1 %v375_v8, %s379_s6 }
 0x2df   :  { %v301_v9 = vpop.permute.xlu1 %300 }
 0x2e0   :  { %307 = vst.msk [vmem:[%s476_s8] sm:$0xff] %vm306_vm5, %v301_v9 }
 0x2e3   :  { %v303_v10 = vpop.permute.xlu1 %302 }
 0x2e4   :  { %308 = vst.msk [vmem:[%s476_s8 + $0x8] sm:$0xff] %vm306_vm5, %v303_v10 }

</bundles_post_ra>
